<compile_context>
chip_gen: v6e
topology: v6e:2x2x1
jax: 0.10.0
libtpu: 0.0.40
codegen_flags: <defaults>
</compile_context>

<pallas_src>
import jax
import jax.numpy as jnp
from jax.experimental import pallas as pl
from jax.experimental.pallas import tpu as pltpu


# --------------------------------------------------------------------------
# Kernel
# --------------------------------------------------------------------------
def _decoder_kernel(x_ref, w_ref, b_ref, o_ref, acc_ref):
    k = pl.program_id(2)

    @pl.when(k == 0)
    def _():
        acc_ref[...] = jnp.zeros_like(acc_ref)

    # Pure MXU accumulate on the inner K steps (bf16 inputs, f32 accumulate).
    acc_ref[...] += jnp.dot(
        x_ref[...], w_ref[...], preferred_element_type=jnp.float32
    )

    @pl.when(k == pl.num_programs(2) - 1)
    def _():
        # Epilogue paid once per output tile: bias (VPU) + sigmoid (EUP).
        o_ref[...] = jax.nn.sigmoid(acc_ref[...] + b_ref[...]).astype(o_ref.dtype)


# --------------------------------------------------------------------------
# Helpers
# --------------------------------------------------------------------------
def _round_up(x, m):
    return ((x + m - 1) // m) * m


def _largest_divisor_tile(padded, unit, max_tile):
    """Largest multiple of `unit` that divides `padded` and is <= max_tile."""
    best = unit
    t = unit
    limit = min(max_tile, padded)
    while t <= limit:
        if padded % t == 0:
            best = t
        t += unit
    return best


def _vmem_bytes(tm, tn, tk, out_bytes):
    """Estimated VMEM for double-buffered inputs/outputs + f32 accumulator."""
    x_b = tm * tk * 2 * 2          # bf16 x tile, 2 buffers
    w_b = tk * tn * 2 * 2          # bf16 W tile, 2 buffers
    bias = 1 * tn * 4 * 2          # f32 bias slice, 2 buffers
    o_b = tm * tn * out_bytes * 2  # output tile, 2 buffers
    acc = tm * tn * 4              # f32 accumulator scratch
    return x_b + w_b + bias + o_b + acc


# --------------------------------------------------------------------------
# One-time parameter preparation (NOT on the per-call hot path)
# --------------------------------------------------------------------------
def prepare_decoder_params(w, b):
    """Transpose, pad to 128-multiples and cast the Linear parameters once.

    w : (F_out, F_in) float32  -- PyTorch nn.Linear .weight layout
    b : (F_out,)      float32
    """
    w = jnp.asarray(w, jnp.float32)
    b = jnp.asarray(b, jnp.float32)
    f_out, f_in = w.shape
    kp = _round_up(f_in, 128)
    np_ = _round_up(f_out, 128)

    w_p = jnp.zeros((kp, np_), jnp.bfloat16).at[:f_in, :f_out].set(
        w.T.astype(jnp.bfloat16)
    )
    b_p = jnp.zeros((1, np_), jnp.float32).at[0, :f_out].set(b)
    return {"w_p": w_p, "b_p": b_p, "f_in": f_in, "f_out": f_out}


# --------------------------------------------------------------------------
# Forward
# --------------------------------------------------------------------------
def decoder_forward(x, params, *, out_dtype=jnp.bfloat16,
                    tm_max=512, tn_max=512, tk_max=1024):
    """sigmoid(x @ W^T + b) via a tiled Pallas TPU kernel.

    x      : (B, F_in) float32 (or bf16) activations
    params : output of prepare_decoder_params (padded bf16 W, f32 b)
    """
    w_p, b_p = params["w_p"], params["b_p"]
    f_in, f_out = params["f_in"], params["f_out"]
    kp, np_ = w_p.shape
    B = x.shape[0]
    assert x.shape[1] == f_in

    # Pad batch to the minimal sublane multiple (16 for bf16 packing if B>8).
    bp = _round_up(B, 8) if B <= 8 else _round_up(B, 16)

    # Tiles = divisors of the (minimally) padded dims -> zero over-padding.
    unit_m = 16 if bp % 16 == 0 else 8
    tm = _largest_divisor_tile(bp, unit_m, tm_max)
    tn = _largest_divisor_tile(np_, 128, tn_max)
    tk = _largest_divisor_tile(kp, 128, tk_max)

    # v7x has 2 TensorCores: make sure the 'parallel' axes have >=2 steps
    # when the problem allows it (split N rather than leave a TC idle).
    if (bp // tm) * (np_ // tn) < 2 and np_ // 128 >= 2:
        tn = _largest_divisor_tile(np_, 128, np_ // 2)

    # Cap tiles to a double-buffered VMEM budget safe on every generation
    # (v7x: 64 MiB per TensorCore).
    out_bytes = jnp.dtype(out_dtype).itemsize
    budget = 40 * (1 << 20)
    while _vmem_bytes(tm, tn, tk, out_bytes) > budget:
        if tk > 128:
            tk = _largest_divisor_tile(kp, 128, tk // 2)
        elif tn > 128:
            tn = _largest_divisor_tile(np_, 128, tn // 2)
        elif tm > unit_m:
            tm = _largest_divisor_tile(bp, unit_m, tm // 2)
        else:
            break

    grid = (bp // tm, np_ // tn, kp // tk)

    # Per-call hot path: only the (small) activation is padded / cast.
    x_p = jnp.zeros((bp, kp), jnp.bfloat16).at[:B, :f_in].set(
        x.astype(jnp.bfloat16)
    )

    # Raise the scoped-VMEM default (16 MiB v5e / 32 MiB v6e) when tiles grow;
    # stay well under v7x's 64 MiB physical ceiling.
    vmem_need = _vmem_bytes(tm, tn, tk, out_bytes)
    vmem_limit = int(min(100 << 20, max(32 << 20, 2 * vmem_need)))

    out_padded = pl.pallas_call(
        _decoder_kernel,
        out_shape=jax.ShapeDtypeStruct((bp, np_), out_dtype),
        grid_spec=pltpu.PrefetchScalarGridSpec(
            num_scalar_prefetch=0,
            grid=grid,
            in_specs=[
                pl.BlockSpec((tm, tk), lambda i, j, k: (i, k)),   # x tile
                pl.BlockSpec((tk, tn), lambda i, j, k: (k, j)),   # W tile
                pl.BlockSpec((1, tn), lambda i, j, k: (0, j)),    # bias slice
            ],
            out_specs=pl.BlockSpec((tm, tn), lambda i, j, k: (i, j)),
            scratch_shapes=[pltpu.VMEM((tm, tn), jnp.float32)],
        ),
        compiler_params=pltpu.CompilerParams(
            dimension_semantics=("parallel", "parallel", "arbitrary"),
            vmem_limit_bytes=vmem_limit,
        ),
    )(x_p, w_p, b_p)

    return out_padded[:B, :f_out]


# --------------------------------------------------------------------------
# Demo / self-test
# --------------------------------------------------------------------------
if __name__ == "__main__":
    # Small, deterministic example consistent with the module:
    # input_feature_size=32, output_feature_size=16, batch=8.
    key = jax.random.PRNGKey(0)
    k_x, k_w, k_b = jax.random.split(key, 3)

    B, F_in, F_out = 8, 32, 16

    x = jax.random.normal(k_x, (B, F_in), dtype=jnp.float32)

    # Deterministic "parameters" mimicking nn.Linear's
    # uniform(-1/sqrt(F_in), 1/sqrt(F_in)) init.
    bound = 1.0 / jnp.sqrt(jnp.float32(F_in))
    w = jax.random.uniform(k_w, (F_out, F_in), jnp.float32, -bound, bound)
    b = jax.random.uniform(k_b, (F_out,), jnp.float32, -bound, bound)

    # One-time weight prep (padding + bf16 cast happens here, not per call).
    params = prepare_decoder_params(w, b)

    out = decoder_forward(x, params)
    out = jax.block_until_ready(out)

    # Reference (plain JAX, f32). bf16 matmul inputs and bf16 output ->
    # slightly looser tolerance; sigmoid (derivative <= 0.25) damps the error.
    ref = jax.nn.sigmoid(x @ w.T + b)
    assert out.shape == (B, F_out)
    assert jnp.allclose(out.astype(jnp.float32), ref, atol=2e-2, rtol=2e-2)

    print("KERNEL_OK")
</pallas_src>

<mosaic_0001>
module attributes {stable_mosaic.version = 11 : i64} {
  func.func @_decoder_kernel(%arg0: i32, %arg1: i32, %arg2: i32, %arg3: memref<8x128xbf16, #tpu.memory_space<vmem>>, %arg4: memref<128x128xbf16, #tpu.memory_space<vmem>>, %arg5: memref<1x128xf32, #tpu.memory_space<vmem>>, %arg6: memref<8x128xbf16, #tpu.memory_space<vmem>>, %arg7: memref<8x128xf32, #tpu.memory_space<vmem>>) attributes {dimension_semantics = [#tpu.dimension_semantics<parallel>, #tpu.dimension_semantics<parallel>, #tpu.dimension_semantics<arbitrary>], iteration_bounds = array<i64: 1, 1, 1>, scalar_prefetch = 0 : i64, scratch_operands = 1 : i64, tpu.core_type = #tpu.core_type<tc>, window_params = [{transform_indices = @transform_0, window_bounds = array<i64: 8, 128>}, {transform_indices = @transform_1, window_bounds = array<i64: 128, 128>}, {transform_indices = @transform_2, window_bounds = array<i64: 1, 128>}, {transform_indices = @transform_3, window_bounds = array<i64: 8, 128>}]} {
    %c0_i32 = arith.constant 0 : i32
    %0 = arith.cmpi eq, %arg2, %c0_i32 : i32
    %1 = arith.extui %0 : i1 to i32
    %c0_i32_0 = arith.constant 0 : i32
    %2 = arith.cmpi ne, %1, %c0_i32_0 : i32
    scf.if %2 {
      %cst_10 = arith.constant 0.000000e+00 : f32
      %12 = vector.broadcast %cst_10 : f32 to vector<8x128xf32>
      %c0_11 = arith.constant 0 : index
      %c0_12 = arith.constant 0 : index
      %13 = vector.load %arg7[%c0_11, %c0_12] : memref<8x128xf32, #tpu.memory_space<vmem>>, vector<8x128xf32>
      tpu.vector_store %arg7[%c0_11, %c0_12], %12 {strides = array<i32>} : memref<8x128xf32, #tpu.memory_space<vmem>>, vector<8x128xf32>,
    } else {
    }
    %c0 = arith.constant 0 : index
    %c0_1 = arith.constant 0 : index
    %3 = vector.load %arg7[%c0, %c0_1] : memref<8x128xf32, #tpu.memory_space<vmem>>, vector<8x128xf32>
    %c0_2 = arith.constant 0 : index
    %c0_3 = arith.constant 0 : index
    %4 = vector.load %arg3[%c0_2, %c0_3] : memref<8x128xbf16, #tpu.memory_space<vmem>>, vector<8x128xbf16>
    %c0_4 = arith.constant 0 : index
    %c0_5 = arith.constant 0 : index
    %5 = vector.load %arg4[%c0_4, %c0_5] : memref<128x128xbf16, #tpu.memory_space<vmem>>, vector<128x128xbf16>
    %cst = arith.constant dense<0.000000e+00> : vector<8x128xf32>
    %6 = tpu.matmul %4, %5, %cst {dimension_numbers = #tpu.dot_dimension_numbers<[1], [0], [0], [1], [0, 0, 1, 1], [], []>} : vector<8x128xbf16>, vector<128x128xbf16>, vector<8x128xf32> -> vector<8x128xf32>
    %7 = arith.addf %3, %6 : vector<8x128xf32>
    %c0_6 = arith.constant 0 : index
    %c0_7 = arith.constant 0 : index
    %8 = vector.load %arg7[%c0_6, %c0_7] : memref<8x128xf32, #tpu.memory_space<vmem>>, vector<8x128xf32>
    tpu.vector_store %arg7[%c0_6, %c0_7], %7 {strides = array<i32>} : memref<8x128xf32, #tpu.memory_space<vmem>>, vector<8x128xf32>,
    %c0_i32_8 = arith.constant 0 : i32
    %9 = arith.cmpi eq, %arg2, %c0_i32_8 : i32
    %10 = arith.extui %9 : i1 to i32
    %c0_i32_9 = arith.constant 0 : i32
    %11 = arith.cmpi ne, %10, %c0_i32_9 : i32
    scf.if %11 {
      %c0_10 = arith.constant 0 : index
      %c0_11 = arith.constant 0 : index
      %12 = vector.load %arg7[%c0_10, %c0_11] : memref<8x128xf32, #tpu.memory_space<vmem>>, vector<8x128xf32>
      %c0_12 = arith.constant 0 : index
      %c0_13 = arith.constant 0 : index
      %13 = vector.load %arg5[%c0_12, %c0_13] : memref<1x128xf32, #tpu.memory_space<vmem>>, vector<1x128xf32>
      %14 = vector.broadcast %13 : vector<1x128xf32> to vector<8x128xf32>
      %15 = arith.addf %12, %14 : vector<8x128xf32>
      %16 = arith.negf %15 : vector<8x128xf32>
      %17 = math.exp %16 : vector<8x128xf32>
      %cst_14 = arith.constant 1.000000e+00 : f32
      %18 = vector.broadcast %cst_14 : f32 to vector<8x128xf32>
      %19 = arith.addf %18, %17 : vector<8x128xf32>
      %20 = arith.divf %18, %19 : vector<8x128xf32>
      %21 = arith.truncf %20 : vector<8x128xf32> to vector<8x128xbf16>
      %c0_15 = arith.constant 0 : index
      %c0_16 = arith.constant 0 : index
      %22 = vector.load %arg6[%c0_15, %c0_16] : memref<8x128xbf16, #tpu.memory_space<vmem>>, vector<8x128xbf16>
      tpu.vector_store %arg6[%c0_15, %c0_16], %21 {strides = array<i32>} : memref<8x128xbf16, #tpu.memory_space<vmem>>, vector<8x128xbf16>,
    } else {
    }
    return
  }
  func.func @transform_0(%arg0: i32, %arg1: i32, %arg2: i32) -> (i32, i32) {
    %c0_i32 = arith.constant 0 : i32
    return %arg0, %arg2 : i32, i32
  }
  func.func @transform_1(%arg0: i32, %arg1: i32, %arg2: i32) -> (i32, i32) {
    %c0_i32 = arith.constant 0 : i32
    return %arg2, %arg1 : i32, i32
  }
  func.func @transform_2(%arg0: i32, %arg1: i32, %arg2: i32) -> (i32, i32) {
    %c0_i32 = arith.constant 0 : i32
    %c0_i32_0 = arith.constant 0 : i32
    return %c0_i32, %arg1 : i32, i32
  }
  func.func @transform_3(%arg0: i32, %arg1: i32, %arg2: i32) -> (i32, i32) {
    %c0_i32 = arith.constant 0 : i32
    return %arg0, %arg1 : i32, i32
  }
}

</mosaic_0001>

<bundles_post_ra>
// kernel: tpu_custom_call.1
= control target key start
LH: loop header
LB: loop body
LE: loop exit
PB: predicated region body
PF: predicated region fallthrough
CT: control target
= control target key end

     0   :  { %8 = vsyncpa [#allocation4], 0  ;;  %s354_s0 = inlined_call_operand.hbm [shape: bf16[8,128], index: 0, kind: input, shape index: {}]   ;;  %s355_s1 = inlined_call_operand.hbm [shape: bf16[128,128], index: 1, kind: input, shape index: {}]   ;;  %s356_s2 = inlined_call_operand.vmem [shape: f32[1,128], index: 2, kind: input, shape index: {}]   ;;  %s357_s3 = inlined_call_operand.hbm [shape: bf16[8,128], index: 3, kind: output, shape index: {}]  }
   0x1   :  { %9 = vsyncpa [#allocation7], 0 }
   0x2   :  { %10 = vsyncpa [#allocation5], 0  ;;  %s315_s12 = smov [#allocation3]   ;;  %s316_s14 = smov [#allocation6]  }
   0x3   :  { %s17_s13 = sshll.u32 %s315_s12, 4  ;;  %s26_s15 = sshll.u32 %s316_s14, 4  ;;  %s18_s13 = int_to_ptr.vmem [resolvable:$true] %s17_s13  ;;  %s27_s15 = int_to_ptr.vmem [resolvable:$true] %s26_s15 }
   0x4   :  { %s257_s16 = scalar_lea.vmem %s18_s13, 64  ;;  %p262_p1 = scmp.lt.s32.totalorder %s18_s13, %s18_s13 }
   0x5   :  { %p258_p0 = scmp.ne.s32.totalorder %s18_s13, %s257_s16  ;;  %p263_p2 = scmp.lt.s32.totalorder %s257_s16, %s257_s16 }
   0x7   :  { %p264_p3 = por %p263_p2, %p262_p1 }
   0x9   :  { %p265_p4 = pnand %p264_p3, %p258_p0 }
   0xb   :  { %268 = shalt.err (!%p265_p4)
}
   0xc   :  { %20 = dma.hbm_to_vmem [thread:$0]  %s354_s0, 64, %s18_s13, [#allocation4]  }
   0xd   :  { %s277_s19 = scalar_lea.vmem %s27_s15, 1024  ;;  %p282_p6 = scmp.lt.s32.totalorder %s27_s15, %s27_s15 }
   0xe   :  { %p278_p5 = scmp.ne.s32.totalorder %s27_s15, %s277_s19  ;;  %p283_p7 = scmp.lt.s32.totalorder %s277_s19, %s277_s19 }
  0x10   :  { %p284_p8 = por %p283_p7, %p282_p6 }
  0x12   :  { %p285_p9 = pnand %p284_p8, %p278_p5 }
  0x14   :  { %288 = shalt.err (!%p285_p9)
}
  0x15   :  { %s317_s20 = smov 64   ;;  %s318_s21 = smov 4  }
  0x16   :  { %32 = dma.hbm_to_vmem [thread:$0]  %s355_s1, 1024, %s27_s15, [#allocation7], %s317_s20, %s317_s20, %s318_s21  }
  0x17   :  { %309 = dma.done.wait [#allocation4], 64  }
  0x18   :  { %310 = vsyncadd [#allocation4], 4294967232 }
  0x19   :  { %311 = dma.done.wait [#allocation7], 1024  }
  0x1a   :  { %312 = vsyncadd [#allocation7], 4294966272  ;;  %v319_v0 = vmov 0.0   ;;  %vm320_vm0 = vmmov 0   ;;  %v237_v1 = vld [vmem:[#allocation6 + $0x38] sm:$0xff]   ;;  %v238_v2 = vld [vmem:[#allocation6 + $0x30] sm:$0xff]  }
  0x1b   :  { %210 = vmatprep.subr.bf16.mxu0 %v319_v0  ;;  %226 = vmatprep.mubr.msk.bf16.mxu0 %vm320_vm0, %v319_v0  ;;  %v239_v3 = vld [vmem:[#allocation6 + $0x28] sm:$0xff]   ;;  %v240_v4 = vld [vmem:[#allocation6 + $0x20] sm:$0xff]   ;;  %v241_v5 = vld [vmem:[#allocation6 + $0x18] sm:$0xff]   ;;  %s321_s24 = smov [#allocation8]  }
  0x1c   :  { %211 = vmatpush3.bf16.msra.mxu0 %v237_v1  ;;  %v242_v6 = vld [vmem:[#allocation6 + $0x10] sm:$0xff]   ;;  %v243_v7 = vld [vmem:[#allocation6 + $0x8] sm:$0xff]   ;;  %v244_v8 = vld [vmem:[#allocation6] sm:$0xff]   ;;  %s181_s25 = sshll.u32 %s321_s24, 4  ;;  %s182_s25 = int_to_ptr.vmem [resolvable:$true] %s181_s25 }
  0x1d   :  { %212 = vmatprep.subr.bf16.mxu0 %v319_v0  ;;  %v48_v9 = vld [vmem:[#allocation3] sm:$0xf]  ;;  %s289_s26 = scalar_lea.vmem %s182_s25, 64  ;;  %p294_p11 = scmp.lt.s32.totalorder %s182_s25, %s182_s25 }
  0x1e   :  { %v199_v10 = vld [vmem:[%s356_s2] ss:$0 sm:$0xff]  ;;  %p290_p10 = scmp.ne.s32.totalorder %s182_s25, %s289_s26  ;;  %p295_p12 = scmp.lt.s32.totalorder %s289_s26, %s289_s26 }
  0x20   :  { %213 = vmatpush3.bf16.msra.mxu0 %v238_v2  ;;  %p296_p13 = por %p295_p12, %p294_p11 }
  0x21   :  { %214 = vmatprep.subr.bf16.mxu0 %v319_v0 }
  0x22   :  { %p297_p0 = pnand %p296_p13, %p290_p10 }
  0x24   :  { %215 = vmatpush3.bf16.msra.mxu0 %v239_v3 }
  0x25   :  { %216 = vmatprep.subr.bf16.mxu0 %v319_v0 }
  0x28   :  { %217 = vmatpush3.bf16.msra.mxu0 %v240_v4 }
  0x29   :  { %218 = vmatprep.subr.bf16.mxu0 %v319_v0 }
  0x2c   :  { %219 = vmatpush3.bf16.msra.mxu0 %v241_v5 }
  0x2d   :  { %220 = vmatprep.subr.bf16.mxu0 %v319_v0 }
  0x30   :  { %221 = vmatpush3.bf16.msra.mxu0 %v242_v6 }
  0x31   :  { %222 = vmatprep.subr.bf16.mxu0 %v319_v0 }
  0x34   :  { %223 = vmatpush3.bf16.msra.mxu0 %v243_v7 }
  0x35   :  { %224 = vmatprep.subr.bf16.mxu0 %v319_v0 }
  0x38   :  { %225 = vmatpush3.bf16.msra.mxu0 %v244_v8 }
  0x3b   :  { %227 = vmatmul.mubr.bf16.vlgmr.msra.gmra.mxu0 %v48_v9 }
  0xfb   :  { %v147_v11 = vpop.f32.mrf.mxu0 }
  0xfc   :  { %v166_v12 = vadd.f32 %v199_v10, %v147_v11 }
  0xfd   :  { %v228_v13 = vpop.f32.mrf.mxu0 }
  0xfe   :  { %v200_v14 = vmul.f32 -1.442695, %v166_v12 }
  0xff   :  { %v150_v15 = vpop.f32.mrf.mxu0 }
 0x100   :  { %245 = vpow2.f32 %v200_v14 }
 0x101   :  { %v229_v16 = vpop.f32.mrf.mxu0 }
 0x10d   :  { %v246_v17 = vpop.eup %245 }
 0x10e   :  { %v170_v18 = vadd.f32 1.0, %v246_v17 }
 0x110   :  { %247 = vrcp.f32 %v170_v18 }
 0x11d   :  { %v248_v19 = vpop.eup %247 }
 0x11e   :  { %v173_v20 = vpack.c.bf16 %v248_v19, %v248_v19 }
 0x120   :  { %174 = vst [vmem:[#allocation8] sm:$0xf] %v173_v20 }
 0x121   :  { %300 = shalt.err (!%p297_p0)
}
 0x122   :  { %184 = dma.vmem_to_hbm [thread:$0]  %s182_s25, 64, %s357_s3, [#allocation5]  }
 0x123   :  { %313 = dma.done.wait [#allocation5], 64  }
 0x124   :  { %314 = vsyncadd [#allocation5], 4294967232 }
 0x125   :  { %188 = vsyncpa [#allocation4], 1 }
 0x126   :  { %189 = vsyncpa [#allocation7], 1 }
 0x127   :  { %190 = vsyncpa [#allocation5], 1 }

</bundles_post_ra>
